<compile_context>
chip_gen: v7x
topology: tpu7x:2x2x1
jax: 0.10.0
libtpu: 0.0.40
codegen_flags: <defaults>
</compile_context>

<pallas_src>
import functools

import jax
import jax.numpy as jnp
from jax.experimental import pallas as pl
from jax.experimental.pallas import tpu as pltpu


_LANE = 128
_SLAB_WIDTH = 512                   # lane-dense slab width (multiple of 128)
_TINY_BYTES = 256 * 1024            # below this, pipelining buys nothing
_MAX_NATIVE_ROW_BYTES = 16 * 1024   # wider native rows than this -> re-slab


def _sublane(itemsize):
    # second-minor tiling requirement per dtype width
    return {4: 8, 2: 16, 1: 32}.get(itemsize, 8)


def _clamp_kernel(bounds_ref, par_ref, out_ref):
    # bounds live in SMEM: changing pmin/pmax never retraces/recompiles.
    out_ref[...] = jnp.clip(par_ref[...], bounds_ref[0], bounds_ref[1])


@functools.lru_cache(maxsize=None)
def _target_block_bytes():
    # v7x: ~2x per-TC HBM bandwidth and 32 MiB scoped-VMEM default, so bigger
    # blocks amortize the ~0.35 us/step overhead. v5e/v6e stay at 2 MiB
    # (v5e scoped-VMEM default is 16 MiB; 2 MiB x 2 operands x 2 buffers fits).
    try:
        kind = jax.devices()[0].device_kind.lower()
    except Exception:
        kind = ""
    return 4 * 1024 * 1024 if "v7" in kind else 2 * 1024 * 1024


def _choose_block_rows(rows, width, itemsize):
    """Row-tile height: whole array if tiny, else sized for both the per-chip
    block-byte target and a grid of at least ~4 steps (pipelining + 2 TCs)."""
    row_bytes = width * itemsize
    if rows * row_bytes <= _TINY_BYTES:
        return rows                                  # single full-extent block
    sub = _sublane(itemsize)
    cap = max(sub, (_target_block_bytes() // row_bytes) // sub * sub)
    want = max(sub, (-(-rows // 4)) // sub * sub)    # >= ~4 grid steps
    return max(sub, min(cap, want))


@functools.lru_cache(maxsize=64)
def _build_clamp_call(rows, width, dtype_name, block_rows):
    dtype = jnp.dtype(dtype_name)
    block_bytes = block_rows * width * dtype.itemsize
    # in block + out block, double-buffered, plus headroom for scalars/SMEM.
    vmem_limit = min(96 * 1024 * 1024, 4 * block_bytes + 2 * 1024 * 1024)
    call = pl.pallas_call(
        _clamp_kernel,
        out_shape=jax.ShapeDtypeStruct((rows, width), dtype),
        grid=(pl.cdiv(rows, block_rows),),
        in_specs=[
            pl.BlockSpec(memory_space=pltpu.MemorySpace.SMEM),    # bounds (2,)
            pl.BlockSpec((block_rows, width), lambda i: (i, 0)),  # parameter slab
        ],
        out_specs=pl.BlockSpec((block_rows, width), lambda i: (i, 0)),
        input_output_aliases={1: 0},
        compiler_params=pltpu.CompilerParams(
            dimension_semantics=("parallel",),
            vmem_limit_bytes=vmem_limit),
    )
    # Donate the parameter slab so the aliasing hint is real (no defensive copy,
    # no extra HBM read+write).
    return jax.jit(call, donate_argnums=(1,))


def pallas_clamp_slab(slab, bounds):
    """Clamp a lane-dense (rows, W) slab to [bounds[0], bounds[1]] in place."""
    rows, width = slab.shape
    block_rows = _choose_block_rows(rows, width, slab.dtype.itemsize)
    fn = _build_clamp_call(rows, width, str(slab.dtype), block_rows)
    return fn(bounds, slab)


class BaseParameterPallas:
    """JAX/Pallas port of torchwi BaseParameter (forward pass only)."""

    def __init__(self, vel, vmin=None, vmax=None):
        self.vmin = vmin
        self.vmax = vmax
        arr = jnp.asarray(self.vel_to_par(vel))
        self._shape = arr.shape
        self._total = arr.size
        itemsize = arr.dtype.itemsize
        if (arr.ndim >= 2 and arr.shape[-1] % _LANE == 0
                and arr.shape[-1] * itemsize <= _MAX_NATIVE_ROW_BYTES):
            # Already lane-dense: keep the native layout (zero-cost reshape).
            self._pad = 0
            self.par = arr.reshape(self._total // arr.shape[-1], arr.shape[-1])
        else:
            # Flatten + pad ONCE at init into a lane-dense (rows, 512) slab so
            # the per-call clamp uses unmasked full-width stores.
            rows = -(-self._total // _SLAB_WIDTH)
            self._pad = rows * _SLAB_WIDTH - self._total
            flat = arr.reshape(self._total)
            if self._pad:
                flat = jnp.pad(flat, (0, self._pad))
            self.par = flat.reshape(rows, _SLAB_WIDTH)
        # `is not None` so vmin/vmax == 0.0 still enables clamping.
        if vmin is not None and vmax is not None:
            self.pmin = min(self.vel_to_par(vmin), self.vel_to_par(vmax))
            self.pmax = max(self.vel_to_par(vmin), self.vel_to_par(vmax))
            self._bounds = jnp.asarray([self.pmin, self.pmax],
                                       dtype=self.par.dtype)

    # identity mappings in the base class
    def vel_to_par(self, vel):
        return vel

    def par_to_vel(self, par):
        return par

    def pclip(self):
        if self.vmin is not None and self.vmax is not None:
            # NOTE: the parameter slab is DONATED to the kernel (true in-place
            # clamp, matching torch's clamp_). If no padding was needed at
            # init, the original `vel` array shares that buffer and becomes
            # invalid after the first forward().
            # TODO(synk): when pclip() runs inside a larger jitted graph next
            # to other elementwise ops, a fused jnp.clip can beat this
            # standalone kernel by removing the dedicated HBM round trip.
            self.par = pallas_clamp_slab(self.par, self._bounds)

    def vel(self):
        par = self.par
        if self._pad:
            par = par.reshape(-1)[: self._total].reshape(self._shape)
        elif par.shape != self._shape:
            par = par.reshape(self._shape)
        return self.par_to_vel(par)

    def forward(self):
        self.pclip()
        return self.vel()

    __call__ = forward

    def report(self):
        return 'Parameter: %s' % self.__class__.__name__

    # TODO(synk): gradient()/gradient_times()/grad_norm()/normalize_gradient()
    # operate on torch autograd state and have no forward-pass Pallas analogue.


if __name__ == "__main__":
    key = jax.random.PRNGKey(0)
    k1, k2, k3 = jax.random.split(key, 3)
    vmin, vmax = 1500.0, 5500.0
    pmin, pmax = min(vmin, vmax), max(vmin, vmax)

    # Case 1: small, lane-aligned model -> native layout, single tiny block.
    vel1 = 3500.0 + 2500.0 * jax.random.normal(k1, (16, 128), dtype=jnp.float32)
    ref1 = jnp.clip(vel1, pmin, pmax)          # reference BEFORE forward (donation)
    out1 = jax.block_until_ready(BaseParameterPallas(vel1, vmin, vmax)())
    assert out1.shape == ref1.shape and out1.dtype == ref1.dtype
    assert jnp.allclose(out1, ref1), "Pallas clamp mismatch (aligned, tiny)"

    # Case 2: ragged NX -> padded lane-dense slab, single tiny block.
    vel2 = 3500.0 + 2500.0 * jax.random.normal(k2, (37, 200), dtype=jnp.float32)
    ref2 = jnp.clip(vel2, pmin, pmax)
    out2 = jax.block_until_ready(BaseParameterPallas(vel2, vmin, vmax)())
    assert out2.shape == ref2.shape and out2.dtype == ref2.dtype
    assert jnp.allclose(out2, ref2), "Pallas clamp mismatch (ragged, tiny)"

    # Case 3: medium ragged model -> padded slab, multi-step pipelined grid
    # (partial last block, SMEM bounds, donated in-place update all exercised).
    vel3 = 3500.0 + 2500.0 * jax.random.normal(k3, (256, 333), dtype=jnp.float32)
    ref3 = jnp.clip(vel3, pmin, pmax)
    out3 = jax.block_until_ready(BaseParameterPallas(vel3, vmin, vmax)())
    assert out3.shape == ref3.shape and out3.dtype == ref3.dtype
    assert jnp.allclose(out3, ref3), "Pallas clamp mismatch (ragged, pipelined)"

    print("KERNEL_OK")
</pallas_src>

<mosaic_0001>
module attributes {stable_mosaic.version = 11 : i64} {
  func.func @_clamp_kernel(%arg0: i32, %arg1: memref<2xf32, #tpu.memory_space<smem>>, %arg2: memref<16x128xf32, #tpu.memory_space<vmem>>, %arg3: memref<16x128xf32, #tpu.memory_space<vmem>>) attributes {dimension_semantics = [#tpu.dimension_semantics<parallel>], iteration_bounds = array<i64: 1>, scalar_prefetch = 0 : i64, scratch_operands = 0 : i64, tpu.core_type = #tpu.core_type<tc>, window_params = [{transform_indices = @transform_0, window_bounds = array<i64: 2>}, {transform_indices = @transform_1, window_bounds = array<i64: 16, 128>}, {transform_indices = @transform_2, window_bounds = array<i64: 16, 128>}]} {
    %c0 = arith.constant 0 : index
    %c0_0 = arith.constant 0 : index
    %0 = vector.load %arg2[%c0, %c0_0] : memref<16x128xf32, #tpu.memory_space<vmem>>, vector<16x128xf32>
    %c0_1 = arith.constant 0 : index
    %1 = memref.load %arg1[%c0_1] : memref<2xf32, #tpu.memory_space<smem>>
    %c1 = arith.constant 1 : index
    %2 = memref.load %arg1[%c1] : memref<2xf32, #tpu.memory_space<smem>>
    %3 = vector.broadcast %1 : f32 to vector<16x128xf32>
    %4 = arith.maximumf %3, %0 : vector<16x128xf32>
    %5 = vector.broadcast %2 : f32 to vector<16x128xf32>
    %6 = arith.minimumf %5, %4 : vector<16x128xf32>
    %c0_2 = arith.constant 0 : index
    %c0_3 = arith.constant 0 : index
    %7 = vector.load %arg3[%c0_2, %c0_3] : memref<16x128xf32, #tpu.memory_space<vmem>>, vector<16x128xf32>
    tpu.vector_store %arg3[%c0_2, %c0_3], %6 {strides = array<i32>} : memref<16x128xf32, #tpu.memory_space<vmem>>, vector<16x128xf32>,
    return
  }
  func.func @transform_0(%arg0: i32) -> i32 {
    %c0_i32 = arith.constant 0 : i32
    %c0_i32_0 = arith.constant 0 : i32
    return %c0_i32 : i32
  }
  func.func @transform_1(%arg0: i32) -> (i32, i32) {
    %c0_i32 = arith.constant 0 : i32
    %c0_i32_0 = arith.constant 0 : i32
    return %arg0, %c0_i32 : i32, i32
  }
  func.func @transform_2(%arg0: i32) -> (i32, i32) {
    %c0_i32 = arith.constant 0 : i32
    %c0_i32_0 = arith.constant 0 : i32
    return %arg0, %c0_i32 : i32, i32
  }
}

</mosaic_0001>

<bundles_post_ra>
// kernel: tpu_custom_call.1
= control target key start
LH: loop header
LB: loop body
LE: loop exit
PB: predicated region body
PF: predicated region fallthrough
CT: control target
= control target key end

     0   :  { %7 = vsyncpa [#allocation5], 0  ;;  %s195_s0 = inlined_call_operand.hbm [shape: f32[2], index: 0, kind: input, shape index: {}]   ;;  %s196_s1 = inlined_call_operand.hbm [shape: f32[16,128], index: 1, kind: input, shape index: {}, may-alias: {1,2}]   ;;  %s197_s2 = inlined_call_operand.hbm [shape: f32[16,128], index: 2, kind: output, shape index: {}, may-alias: {1,2}]  }
   0x1   :  { %8 = vsyncpa [#allocation3], 0 }
   0x2   :  { %9 = vsyncpa [#allocation4], 0  ;;  %s73_s11 = scalar_lea.hbm %s195_s0, 16 }
   0x3   :  { %p74_p0 = scmp.ne.s32.totalorder %s195_s0, %s73_s11  ;;  %p77_p1 = scmp.lt.u32.totalorder %s73_s11, %s195_s0 }
   0x5   :  { %p79_p2 = pnand %p77_p1, %p74_p0 }
   0x7   :  { %82 = shalt.err (!%p79_p2)
}
   0x8   :  { %s133_s16 = smov [#allocation2]   ;;  %s134_s19 = smov [#allocation6]  }
   0x9   :  { %17 = dma.hbm_to_smem %s195_s0, 16, %s133_s16, [#allocation5]  }
   0xa   :  { %s23_s20 = sshll.u32 %s134_s19, 4  ;;  %s83_s23 = scalar_lea.hbm %s196_s1, 256  ;;  %s24_s20 = int_to_ptr.vmem [resolvable:$true] %s23_s20 }
   0xb   :  { %p84_p3 = scmp.ne.s32.totalorder %s196_s1, %s83_s23  ;;  %p87_p4 = scmp.lt.u32.totalorder %s83_s23, %s196_s1 }
   0xd   :  { %p89_p5 = pnand %p87_p4, %p84_p3 }
   0xf   :  { %92 = shalt.err (!%p89_p5)
}
  0x10   :  { %s93_s28 = scalar_lea.vmem %s24_s20, 256  ;;  %p98_p7 = scmp.lt.s32.totalorder %s24_s20, %s24_s20 }
  0x11   :  { %p94_p6 = scmp.ne.s32.totalorder %s24_s20, %s93_s28  ;;  %p99_p8 = scmp.lt.s32.totalorder %s93_s28, %s93_s28 }
  0x13   :  { %p100_p9 = por %p99_p8, %p98_p7 }
  0x15   :  { %p101_p10 = pnand %p100_p9, %p94_p6 }
  0x17   :  { %104 = shalt.err (!%p101_p10)
}
  0x18   :  { %s135_s0 = smov 128   ;;  %s136_s29 = smov 8  }
  0x19   :  { %29 = dma.hbm_to_vmem [thread:$0]  %s196_s1, 256, %s24_s20, [#allocation3], %s135_s0, %s135_s0, %s136_s29  }
  0x1a   :  { %127 = dma.done.wait [#allocation5], 16  }
  0x1b   :  { %128 = vsyncadd [#allocation5], 4294967280 }
  0x1c   :  { %129 = dma.done.wait [#allocation3], 256  }
  0x1d   :  { %130 = vsyncadd [#allocation3], 4294967040 }
  0x1e   :  { %36 = sfence }
  0x1f   :  { %s39_s4 = sld [smem:[#allocation2]]  ;;  %s67_s5 = sld [smem:[#allocation2 + $0x1]]  ;;  %v37_v0 = vld [vmem:[#allocation6] sm:$0xff]  ;;  %v38_v1 = vld [vmem:[#allocation6 + $0x8] sm:$0xff] }
  0x20   :  { %s137_s6 = smov [#allocation7]  }
  0x21   :  { %s54_s7 = sshll.u32 %s137_s6, 4  ;;  %s55_s7 = int_to_ptr.vmem [resolvable:$true] %s54_s7 }
  0x22   :  { %s105_s1 = scalar_lea.vmem %s55_s7, 256  ;;  %p110_p12 = scmp.lt.s32.totalorder %s55_s7, %s55_s7 }
  0x23   :  { %p106_p11 = scmp.ne.s32.totalorder %s55_s7, %s105_s1  ;;  %p111_p13 = scmp.lt.s32.totalorder %s105_s1, %s105_s1 }
  0x25   :  { %v41_v2 = vstv %s39_s4  ;;  %v44_v3 = vstv %s67_s5  ;;  %p112_p0 = por %p111_p13, %p110_p12 }
  0x26   :  { %v42_v4 = vmax.f32 %v41_v2, %v37_v0  ;;  %v43_v5 = vmax.f32 %v41_v2, %v38_v1 }
  0x27   :  { %p113_p1 = pnand %p112_p0, %p106_p11 }
  0x28   :  { %v45_v6 = vmin.f32 %v44_v3, %v42_v4  ;;  %v46_v7 = vmin.f32 %v44_v3, %v43_v5 }
  0x2a   :  { %47 = vst [vmem:[#allocation7] sm:$0xff] %v45_v6  ;;  %48 = vst [vmem:[#allocation7 + $0x8] sm:$0xff] %v46_v7 }
  0x2b   :  { %116 = shalt.err (!%p113_p1)
}
  0x2c   :  { %s117_s10 = scalar_lea.hbm %s197_s2, 256 }
  0x2d   :  { %p118_p2 = scmp.ne.s32.totalorder %s197_s2, %s117_s10  ;;  %p121_p3 = scmp.lt.u32.totalorder %s117_s10, %s197_s2 }
  0x2f   :  { %p123_p4 = pnand %p121_p3, %p118_p2 }
  0x31   :  { %126 = shalt.err (!%p123_p4)
}
  0x32   :  { %60 = dma.vmem_to_hbm [thread:$0]  %s55_s7, 256, %s197_s2, [#allocation4], %s135_s0, %s135_s0, %s136_s29  }
  0x33   :  { %131 = dma.done.wait [#allocation4], 256  }
  0x34   :  { %132 = vsyncadd [#allocation4], 4294967040 }
  0x35   :  { %64 = vsyncpa [#allocation3], 1 }
  0x36   :  { %65 = vsyncpa [#allocation4], 1 }
  0x37   :  { %66 = vsyncpa [#allocation5], 1 }

</bundles_post_ra>
